<compile_context>
chip_gen: v7x
topology: tpu7x:2x2x1
jax: 0.10.0
libtpu: 0.0.40
codegen_flags: <defaults>
</compile_context>

<pallas_src>
import functools
import numpy as np
import jax
import jax.numpy as jnp
from jax.experimental import pallas as pl
from jax.experimental.pallas import tpu as pltpu


_VMEM_BUDGET = 40 * 1024 * 1024      # target per-step working set
_VMEM_LIMIT = 48 * 1024 * 1024       # scoped VMEM limit (fits v7x's 64 MiB/TC)


# ----------------------------- Pallas kernel --------------------------------
def _lmmd_tile_kernel(row_idx_ref, col_idx_ref,        # scalar prefetch (SMEM int32)
                      neg_inv_ref,                      # SMEM (kernel_num,) f32
                      rows_ref, cols_ref,               # (T, D) feature tiles
                      sqr_ref, sqc_ref,                 # (T, 1) / (1, T) f32 row norms
                      cr_ref, cc_ref,                   # (T, C) signed class weights
                      o_ref,                            # (1, 128) f32 per-row-tile out
                      acc_ref,                          # VMEM scratch (T, C) f32
                      *, kernel_mul, kernel_num, bf16_gram):
    ii = pl.program_id(0)
    jj = pl.program_id(1)
    wgrid = pl.num_programs(1)

    r = row_idx_ref[ii, jj]
    c = col_idx_ref[ii, jj]
    prev_r = row_idx_ref[ii, jnp.maximum(jj - 1, 0)]
    next_r = row_idx_ref[ii, jnp.minimum(jj + 1, wgrid - 1)]
    is_first = jnp.logical_or(jj == 0, prev_r != r)
    is_last = jnp.logical_or(jj == wgrid - 1, next_r != r)
    # Off-diagonal tiles stand in for their mirror image (K and the weight
    # matrix c c^T are both symmetric), so they count twice.
    pair_w = jnp.where(r == c, jnp.float32(1.0), jnp.float32(2.0))

    rows = rows_ref[...]
    cols = cols_ref[...]
    if bf16_gram:
        rows = rows.astype(jnp.bfloat16)
        cols = cols.astype(jnp.bfloat16)

    dn = (((1,), (1,)), ((), ()))   # contract the feature (lane) axis
    gram = jax.lax.dot_general(rows, cols, dn,
                               preferred_element_type=jnp.float32)    # (Tm, Tn)
    # Precomputed norms: (T,1) + (1,T) broadcast; no per-tile ones-matmul.
    l2 = jnp.maximum(sqr_ref[...] + sqc_ref[...] - 2.0 * gram, 0.0)

    if kernel_mul == 2.0 and kernel_num > 1:
        # One EUP exp at the largest bandwidth; remaining terms by squaring:
        # exp(-l2/(bw*2^(K-1)))^(2^j) == exp(-l2/(bw*2^(K-1-j)))
        e = jnp.exp(l2 * neg_inv_ref[kernel_num - 1])
        kern = e
        t = e
        for _ in range(kernel_num - 1):
            t = t * t
            kern = kern + t
    else:
        kern = jnp.exp(l2 * neg_inv_ref[0])
        for k in range(1, kernel_num):
            kern = kern + jnp.exp(l2 * neg_inv_ref[k])

    # Trace form: accumulate K_tile @ c_cols across this row segment; reduce
    # against c_rows once at the segment end (one XLU reduce per segment).
    kc = pair_w * jnp.dot(kern, cc_ref[...], preferred_element_type=jnp.float32)

    @pl.when(is_first)
    def _():
        acc_ref[...] = jnp.zeros_like(acc_ref)

    acc_ref[...] += kc

    @pl.when(is_last)
    def _():
        partial = jnp.sum(cr_ref[...] * acc_ref[...])
        o_ref[...] = jnp.zeros_like(o_ref) + partial


# ---------------------- triangle schedule (host side) ------------------------
def _triangle_tables(g):
    """(row_tile, col_tile) schedule for the upper triangle of the g x g grid.

    Grid row ii pairs triangle row ii (g-ii tiles) with triangle row g-1-ii
    (ii+1 tiles): exactly g+1 steps per grid row, and every output row tile is
    confined to one contiguous segment of a single grid row (so the leading
    grid axis can be 'parallel').
    """
    if g == 1:
        return np.zeros((1, 1), np.int32), np.zeros((1, 1), np.int32)
    assert g % 2 == 0
    g2, width = g // 2, g + 1
    row_idx = np.zeros((g2, width), np.int32)
    col_idx = np.zeros((g2, width), np.int32)
    for ii in range(g2):
        ra, rb = ii, g - 1 - ii
        pairs = [(ra, j) for j in range(ra, g)] + [(rb, j) for j in range(rb, g)]
        assert len(pairs) == width
        for k, (rr, cc) in enumerate(pairs):
            row_idx[ii, k] = rr
            col_idx[ii, k] = cc
    return row_idx, col_idx


def lmmd_rbf_pallas(total, c, row_norms, neg_inv, *, tile, kernel_mul,
                    kernel_num, bf16_gram):
    n_pad, d = total.shape
    num_class = c.shape[1]
    g = n_pad // tile
    row_idx, col_idx = _triangle_tables(g)
    g2, width = row_idx.shape

    sq_col = row_norms.reshape(n_pad, 1)      # broadcast over rows (sublanes)
    sq_row = row_norms.reshape(1, n_pad)      # broadcast over cols (lanes)

    feat_bytes = total.dtype.itemsize
    steps = g2 * width
    cost = pl.CostEstimate(
        flops=int(steps * (2 * tile * tile * d + 2 * tile * tile * num_class)),
        transcendentals=int(steps * tile * tile),
        bytes_accessed=int(steps * 2 * tile * d * feat_bytes
                           + steps * 2 * tile * num_class * 4
                           + n_pad * 4 * 2 + g * 128 * 4),
    )

    kernel = functools.partial(_lmmd_tile_kernel, kernel_mul=kernel_mul,
                               kernel_num=kernel_num, bf16_gram=bf16_gram)
    out = pl.pallas_call(
        kernel,
        out_shape=jax.ShapeDtypeStruct((g, 128), jnp.float32),
        grid_spec=pltpu.PrefetchScalarGridSpec(
            num_scalar_prefetch=2,                       # row_idx, col_idx tables
            grid=(g2, width),
            in_specs=[
                pl.BlockSpec(memory_space=pltpu.MemorySpace.SMEM),               # neg_inv (K,)
                pl.BlockSpec((tile, d), lambda i, j, ri, ci: (ri[i, j], 0)),      # rows
                pl.BlockSpec((tile, d), lambda i, j, ri, ci: (ci[i, j], 0)),      # cols
                pl.BlockSpec((tile, 1), lambda i, j, ri, ci: (ri[i, j], 0)),      # sq rows
                pl.BlockSpec((1, tile), lambda i, j, ri, ci: (0, ci[i, j])),      # sq cols
                pl.BlockSpec((tile, num_class), lambda i, j, ri, ci: (ri[i, j], 0)),  # c rows
                pl.BlockSpec((tile, num_class), lambda i, j, ri, ci: (ci[i, j], 0)),  # c cols
            ],
            out_specs=pl.BlockSpec((1, 128), lambda i, j, ri, ci: (ri[i, j], 0)),
            scratch_shapes=[pltpu.VMEM((tile, num_class), jnp.float32)],
        ),
        compiler_params=pltpu.CompilerParams(
            dimension_semantics=("parallel", "arbitrary"),
            vmem_limit_bytes=_VMEM_LIMIT),
        cost_estimate=cost,
    )(jnp.asarray(row_idx), jnp.asarray(col_idx),
      neg_inv, total, total, sq_col, sq_row, c, c)
    # One partial per row tile (replicated across the 128 lanes).
    return jnp.sum(out[:, 0])


# ------------------------------ JAX glue -------------------------------------
def _cal_weight_vectors(source_label, target_logits, num_class):
    """Masked, column-normalized class vectors + 1/count scale."""
    source_label = source_label.astype(jnp.int32)
    onehot = jax.nn.one_hot(source_label, num_class, dtype=jnp.float32)     # (B, C)
    s_sum = jnp.sum(onehot, axis=0, keepdims=True)
    s_sum = jnp.where(s_sum == 0, jnp.float32(100.0), s_sum)
    onehot_n = onehot / s_sum

    target_logits = target_logits.astype(jnp.float32)
    target_label = jnp.argmax(target_logits, axis=1)
    t_sum = jnp.sum(target_logits, axis=0, keepdims=True)
    t_sum = jnp.where(t_sum == 0, jnp.float32(100.0), t_sum)
    t_n = target_logits / t_sum

    classes = jnp.arange(num_class)
    in_s = jnp.any(source_label[:, None] == classes[None, :], axis=0)
    in_t = jnp.any(target_label[:, None] == classes[None, :], axis=0)
    valid = jnp.logical_and(in_s, in_t).astype(jnp.float32)                 # (C,)
    count = jnp.sum(valid)
    scale = jnp.where(count > 0, 1.0 / jnp.maximum(count, 1.0), 0.0)

    s_m = onehot_n * valid[None, :]
    t_m = t_n * valid[None, :]
    return s_m, t_m, scale.astype(jnp.float32)


def _vmem_estimate(tile, d, feat_bytes):
    feats = 4 * tile * d * feat_bytes        # rows + cols, double-buffered
    temps = 6 * tile * tile * 4              # gram / l2 / exp / kern temporaries
    small = 8 * tile * 128 * 4               # class blocks, norms, scratch, output
    return feats + temps + small


def _pick_tile(n, d, feat_bytes):
    n8 = max(8, ((n + 7) // 8) * 8)
    if n8 <= 512 and _vmem_estimate(n8, d, feat_bytes) <= _VMEM_BUDGET:
        return n8                            # whole problem fits a single tile pair
    for t in (512, 256, 128):                # keep the MXU N-dim >= 128 (256+ on v6e/v7x)
        if t <= max(n8, 128) and _vmem_estimate(t, d, feat_bytes) <= _VMEM_BUDGET:
            return t
    # TODO(synk): for extremely large D, tile the contraction dim in-kernel
    # (inner loop accumulating the Gram in VMEM scratch) instead of shrinking tiles.
    return 128


@functools.partial(jax.jit, static_argnames=("num_class", "kernel_mul", "kernel_num",
                                             "bf16_gram", "tile_override"))
def _lmmd_forward(source, target, source_label, target_logits, *, num_class,
                  kernel_mul, kernel_num, bf16_gram=False, tile_override=None):
    B, D = source.shape
    n = 2 * B
    s_m, t_m, scale = _cal_weight_vectors(source_label, target_logits, num_class)

    # Keep features in input dtype (bf16 stays bf16 on the MXU, f32 accumulate).
    feat_dtype = jnp.promote_types(source.dtype, target.dtype)
    total = jnp.concatenate([source.astype(feat_dtype),
                             target.astype(feat_dtype)], axis=0)            # (2B, D)

    # Analytic bandwidth: sum_ij ||xi-xj||^2 = 2n*sum_i||xi||^2 - 2*||sum_i xi||^2.
    # Row norms are reused inside the kernel (no per-tile recomputation).
    tf = total.astype(jnp.float32)
    row_norms = jnp.sum(tf * tf, axis=1)                                    # (2B,)
    sq_sum = jnp.sum(row_norms)
    col_sum = jnp.sum(tf, axis=0)
    l2_sum = jnp.maximum(2.0 * n * sq_sum - 2.0 * jnp.sum(col_sum * col_sum), 0.0)
    bandwidth = l2_sum / float(n * n - n)
    bandwidth = bandwidth / (kernel_mul ** (kernel_num // 2))
    # Hoisted per-bandwidth reciprocals: exp(-l2/bw_k) == exp(l2 * neg_inv[k]).
    neg_inv = (-1.0 / (bandwidth *
                       (kernel_mul ** jnp.arange(kernel_num, dtype=jnp.float32))))
    neg_inv = neg_inv.astype(jnp.float32)                                   # (K,)

    # Unified signed weights: c c^T == [[w_ss, -w_st], [-w_st^T, w_tt]] * count.
    c = jnp.concatenate([s_m, -t_m], axis=0)                                # (2B, C)

    feat_bytes = int(jnp.dtype(feat_dtype).itemsize)
    tile = tile_override if tile_override is not None else _pick_tile(n, D, feat_bytes)
    g = -(-n // tile)
    if g > 1 and g % 2 == 1:
        g += 1                    # even # of row tiles -> perfectly balanced pairing
    n_pad = g * tile
    assert tile % 8 == 0 and (g == 1 or tile % 128 == 0), (tile, g)

    if n_pad != n:      # zero-padded rows carry c == 0, so they contribute nothing
        total = jnp.pad(total, ((0, n_pad - n), (0, 0)))
        c = jnp.pad(c, ((0, n_pad - n), (0, 0)))
        row_norms = jnp.pad(row_norms, (0, n_pad - n))

    wsum = lmmd_rbf_pallas(total, c, row_norms, neg_inv, tile=tile,
                           kernel_mul=kernel_mul, kernel_num=kernel_num,
                           bf16_gram=bf16_gram)
    loss = wsum * scale
    # Reference returns 0 when the kernel matrix contains NaN (NaN propagates
    # into the weighted sum, including the all-identical-rows bandwidth==0 case).
    loss = jnp.where(jnp.isnan(loss), jnp.float32(0.0), loss)
    return loss


class LMMDLossPallas:
    """Mirror of LMMDLoss(MMDLoss, LambdaSheduler) with kernel_type='rbf'."""

    def __init__(self, num_class, kernel_type="rbf", kernel_mul=2.0, kernel_num=5,
                 fix_sigma=None, gamma=1.0, max_iter=1000,
                 bf16_gram=False, tile_override=None):
        assert kernel_type == "rbf", "Linear kernel is not supported (as in reference)."
        self.num_class = num_class
        self.kernel_mul = kernel_mul
        self.kernel_num = kernel_num
        self.fix_sigma = None          # reference forces None
        self.gamma = gamma
        self.max_iter = max_iter
        self.curr_iter = 0
        self.bf16_gram = bf16_gram     # bf16 Gram matmul (re-validate accuracy per-use)
        self.tile_override = tile_override

    def lamb(self):
        p = self.curr_iter / self.max_iter
        return 2.0 / (1.0 + np.exp(-self.gamma * p)) - 1

    def step(self):
        self.curr_iter = min(self.curr_iter + 1, self.max_iter)

    def __call__(self, source, target, source_label, target_logits):
        loss = _lmmd_forward(source, target, source_label, target_logits,
                             num_class=self.num_class,
                             kernel_mul=self.kernel_mul,
                             kernel_num=self.kernel_num,
                             bf16_gram=self.bf16_gram,
                             tile_override=self.tile_override)
        lamb = self.lamb()
        self.step()
        return loss * jnp.float32(lamb)


# --------------------------- NumPy reference ---------------------------------
def _numpy_reference(source, target, source_label, target_logits, *, num_class,
                     curr_iter, gamma, max_iter, kernel_mul=2.0, kernel_num=5):
    B = source.shape[0]
    onehot = np.eye(num_class, dtype=np.float64)[source_label]
    s_sum = onehot.sum(0, keepdims=True)
    s_sum[s_sum == 0] = 100
    onehot = onehot / s_sum
    t = target_logits.astype(np.float64)
    t_lab = t.argmax(1)
    t_sum = t.sum(0, keepdims=True)
    t_sum[t_sum == 0] = 100
    t = t / t_sum
    w_ss = np.zeros((B, B)); w_tt = np.zeros((B, B)); w_st = np.zeros((B, B))
    count = 0
    set_s, set_t = set(source_label.tolist()), set(t_lab.tolist())
    for i in range(num_class):
        if i in set_s and i in set_t:
            s_v = onehot[:, i:i + 1]
            t_v = t[:, i:i + 1]
            w_ss += s_v @ s_v.T
            w_tt += t_v @ t_v.T
            w_st += s_v @ t_v.T
            count += 1
    if count != 0:
        w_ss /= count; w_tt /= count; w_st /= count
    else:
        w_ss = w_tt = w_st = np.zeros((B, B))
    total = np.concatenate([source, target], 0).astype(np.float64)
    n = 2 * B
    l2 = ((total[None] - total[:, None]) ** 2).sum(2)
    bw = l2.sum() / (n * n - n)
    bw /= kernel_mul ** (kernel_num // 2)
    kernels = sum(np.exp(-l2 / (bw * kernel_mul ** k)) for k in range(kernel_num))
    SS = kernels[:B, :B]; TT = kernels[B:, B:]; ST = kernels[:B, B:]
    loss = np.sum(w_ss * SS + w_tt * TT - 2.0 * w_st * ST)
    p = curr_iter / max_iter
    lamb = 2.0 / (1.0 + np.exp(-gamma * p)) - 1
    return np.float32(loss * lamb)


# --------------------------------- main ---------------------------------------
if __name__ == "__main__":
    C = 5

    # Test 1: single-tile path (B=8 -> n=16, D=32).
    key = jax.random.PRNGKey(0)
    k1, k2, k3, k4 = jax.random.split(key, 4)
    B, D = 8, 32
    source = jax.random.normal(k1, (B, D), dtype=jnp.float32)
    target = jax.random.normal(k2, (B, D), dtype=jnp.float32) + 0.5
    source_label = jax.random.randint(k3, (B,), 0, C, dtype=jnp.int32)
    target_logits = jax.nn.softmax(
        jax.random.normal(k4, (B, C), dtype=jnp.float32), axis=1)

    mod = LMMDLossPallas(num_class=C)
    mod.curr_iter = 10
    loss = jax.block_until_ready(mod(source, target, source_label, target_logits))
    ref = _numpy_reference(np.asarray(source), np.asarray(target),
                           np.asarray(source_label), np.asarray(target_logits),
                           num_class=C, curr_iter=10, gamma=1.0, max_iter=1000)
    assert np.isfinite(np.asarray(loss)).all()
    assert np.allclose(np.asarray(loss), ref, rtol=2e-3, atol=1e-5), (float(loss), float(ref))

    # Test 2: multi-tile triangle path (B=80 -> n=160, tile=128 -> 2x2 tile grid,
    # exercises segment switching, off-diagonal doubling and zero padding).
    k5, k6, k7, k8 = jax.random.split(jax.random.PRNGKey(1), 4)
    B2, D2 = 80, 32
    source2 = jax.random.normal(k5, (B2, D2), dtype=jnp.float32)
    target2 = jax.random.normal(k6, (B2, D2), dtype=jnp.float32) + 0.5
    source_label2 = jax.random.randint(k7, (B2,), 0, C, dtype=jnp.int32)
    target_logits2 = jax.nn.softmax(
        jax.random.normal(k8, (B2, C), dtype=jnp.float32), axis=1)

    mod2 = LMMDLossPallas(num_class=C, tile_override=128)
    mod2.curr_iter = 500
    loss2 = jax.block_until_ready(mod2(source2, target2, source_label2, target_logits2))
    ref2 = _numpy_reference(np.asarray(source2), np.asarray(target2),
                            np.asarray(source_label2), np.asarray(target_logits2),
                            num_class=C, curr_iter=500, gamma=1.0, max_iter=1000)
    assert np.isfinite(np.asarray(loss2)).all()
    assert np.allclose(np.asarray(loss2), ref2, rtol=2e-3, atol=1e-4), (float(loss2), float(ref2))

    print("KERNEL_OK")
</pallas_src>

<mosaic_0001>
module attributes {stable_mosaic.version = 11 : i64} {
  func.func @_lmmd_tile_kernel(%arg0: i32, %arg1: i32, %arg2: memref<1x1xi32, #tpu.memory_space<smem>>, %arg3: memref<1x1xi32, #tpu.memory_space<smem>>, %arg4: memref<5xf32, #tpu.memory_space<smem>>, %arg5: memref<16x32xf32, #tpu.memory_space<vmem>>, %arg6: memref<16x32xf32, #tpu.memory_space<vmem>>, %arg7: memref<16x1xf32, #tpu.memory_space<vmem>>, %arg8: memref<1x16xf32, #tpu.memory_space<vmem>>, %arg9: memref<16x5xf32, #tpu.memory_space<vmem>>, %arg10: memref<16x5xf32, #tpu.memory_space<vmem>>, %arg11: memref<1x128xf32, #tpu.memory_space<vmem>>, %arg12: memref<16x5xf32, #tpu.memory_space<vmem>>) attributes {dimension_semantics = [#tpu.dimension_semantics<parallel>, #tpu.dimension_semantics<arbitrary>], iteration_bounds = array<i64: 1, 1>, scalar_prefetch = 2 : i64, scratch_operands = 1 : i64, tpu.core_type = #tpu.core_type<tc>, window_params = [{transform_indices = @transform_0, window_bounds = array<i64: 5>}, {transform_indices = @transform_1, window_bounds = array<i64: 16, 32>}, {transform_indices = @transform_2, window_bounds = array<i64: 16, 32>}, {transform_indices = @transform_3, window_bounds = array<i64: 16, 1>}, {transform_indices = @transform_4, window_bounds = array<i64: 1, 16>}, {transform_indices = @transform_5, window_bounds = array<i64: 16, 5>}, {transform_indices = @transform_6, window_bounds = array<i64: 16, 5>}, {transform_indices = @transform_7, window_bounds = array<i64: 1, 128>}]} {
    %0 = arith.index_cast %arg0 : i32 to index
    %1 = arith.index_cast %arg1 : i32 to index
    %2 = memref.load %arg2[%0, %1] : memref<1x1xi32, #tpu.memory_space<smem>>
    %3 = arith.index_cast %arg0 : i32 to index
    %4 = arith.index_cast %arg1 : i32 to index
    %5 = memref.load %arg3[%3, %4] : memref<1x1xi32, #tpu.memory_space<smem>>
    %c1_i32 = arith.constant 1 : i32
    %6 = arith.subi %arg1, %c1_i32 : i32
    %c0_i32 = arith.constant 0 : i32
    %7 = arith.maxsi %6, %c0_i32 : i32
    %8 = arith.index_cast %arg0 : i32 to index
    %9 = arith.index_cast %7 : i32 to index
    %10 = memref.load %arg2[%8, %9] : memref<1x1xi32, #tpu.memory_space<smem>>
    %c1_i32_0 = arith.constant 1 : i32
    %11 = arith.addi %arg1, %c1_i32_0 : i32
    %c0_i32_1 = arith.constant 0 : i32
    %12 = arith.minsi %11, %c0_i32_1 : i32
    %13 = arith.index_cast %arg0 : i32 to index
    %14 = arith.index_cast %12 : i32 to index
    %15 = memref.load %arg2[%13, %14] : memref<1x1xi32, #tpu.memory_space<smem>>
    %c0_i32_2 = arith.constant 0 : i32
    %16 = arith.cmpi eq, %arg1, %c0_i32_2 : i32
    %17 = arith.cmpi ne, %10, %2 : i32
    %18 = arith.ori %16, %17 : i1
    %c0_i32_3 = arith.constant 0 : i32
    %19 = arith.cmpi eq, %arg1, %c0_i32_3 : i32
    %20 = arith.cmpi ne, %15, %2 : i32
    %21 = arith.ori %19, %20 : i1
    %22 = arith.cmpi eq, %2, %5 : i32
    %cst = arith.constant 1.000000e+00 : f32
    %cst_4 = arith.constant 2.000000e+00 : f32
    %23 = arith.select %22, %cst, %cst_4 : f32
    %c0 = arith.constant 0 : index
    %c0_5 = arith.constant 0 : index
    %24 = vector.load %arg5[%c0, %c0_5] : memref<16x32xf32, #tpu.memory_space<vmem>>, vector<16x32xf32>
    %c0_6 = arith.constant 0 : index
    %c0_7 = arith.constant 0 : index
    %25 = vector.load %arg6[%c0_6, %c0_7] : memref<16x32xf32, #tpu.memory_space<vmem>>, vector<16x32xf32>
    %cst_8 = arith.constant dense<0.000000e+00> : vector<16x16xf32>
    %26 = tpu.matmul %24, %25, %cst_8 {dimension_numbers = #tpu.dot_dimension_numbers<[1], [1], [0], [0], [0, 0, 1, 0], [], []>} : vector<16x32xf32>, vector<16x32xf32>, vector<16x16xf32> -> vector<16x16xf32>
    %c0_9 = arith.constant 0 : index
    %c0_10 = arith.constant 0 : index
    %27 = vector.load %arg7[%c0_9, %c0_10] : memref<16x1xf32, #tpu.memory_space<vmem>>, vector<16x1xf32>
    %c0_11 = arith.constant 0 : index
    %c0_12 = arith.constant 0 : index
    %28 = vector.load %arg8[%c0_11, %c0_12] : memref<1x16xf32, #tpu.memory_space<vmem>>, vector<1x16xf32>
    %29 = vector.broadcast %27 : vector<16x1xf32> to vector<16x16xf32>
    %30 = vector.broadcast %28 : vector<1x16xf32> to vector<16x16xf32>
    %31 = arith.addf %29, %30 : vector<16x16xf32>
    %cst_13 = arith.constant 2.000000e+00 : f32
    %32 = vector.broadcast %cst_13 : f32 to vector<16x16xf32>
    %33 = arith.mulf %32, %26 : vector<16x16xf32>
    %34 = arith.subf %31, %33 : vector<16x16xf32>
    %cst_14 = arith.constant 0.000000e+00 : f32
    %35 = vector.broadcast %cst_14 : f32 to vector<16x16xf32>
    %36 = arith.maximumf %34, %35 : vector<16x16xf32>
    %c4 = arith.constant 4 : index
    %37 = memref.load %arg4[%c4] : memref<5xf32, #tpu.memory_space<smem>>
    %38 = vector.broadcast %37 : f32 to vector<16x16xf32>
    %39 = arith.mulf %36, %38 : vector<16x16xf32>
    %40 = math.exp %39 : vector<16x16xf32>
    %41 = arith.mulf %40, %40 : vector<16x16xf32>
    %42 = arith.addf %40, %41 : vector<16x16xf32>
    %43 = arith.mulf %41, %41 : vector<16x16xf32>
    %44 = arith.addf %42, %43 : vector<16x16xf32>
    %45 = arith.mulf %43, %43 : vector<16x16xf32>
    %46 = arith.addf %44, %45 : vector<16x16xf32>
    %47 = arith.mulf %45, %45 : vector<16x16xf32>
    %48 = arith.addf %46, %47 : vector<16x16xf32>
    %c0_15 = arith.constant 0 : index
    %c0_16 = arith.constant 0 : index
    %49 = vector.load %arg10[%c0_15, %c0_16] : memref<16x5xf32, #tpu.memory_space<vmem>>, vector<16x5xf32>
    %cst_17 = arith.constant dense<0.000000e+00> : vector<16x5xf32>
    %50 = tpu.matmul %48, %49, %cst_17 {dimension_numbers = #tpu.dot_dimension_numbers<[1], [0], [0], [1], [0, 0, 1, 1], [], []>} : vector<16x16xf32>, vector<16x5xf32>, vector<16x5xf32> -> vector<16x5xf32>
    %51 = vector.broadcast %23 : f32 to vector<16x5xf32>
    %52 = arith.mulf %51, %50 : vector<16x5xf32>
    %53 = arith.extui %18 : i1 to i32
    %c0_i32_18 = arith.constant 0 : i32
    %54 = arith.cmpi ne, %53, %c0_i32_18 : i32
    scf.if %54 {
      %cst_24 = arith.constant 0.000000e+00 : f32
      %60 = vector.broadcast %cst_24 : f32 to vector<16x5xf32>
      %c0_25 = arith.constant 0 : index
      %c0_26 = arith.constant 0 : index
      %61 = vector.load %arg12[%c0_25, %c0_26] : memref<16x5xf32, #tpu.memory_space<vmem>>, vector<16x5xf32>
      tpu.vector_store %arg12[%c0_25, %c0_26], %60 {strides = array<i32>} : memref<16x5xf32, #tpu.memory_space<vmem>>, vector<16x5xf32>,
    } else {
    }
    %c0_19 = arith.constant 0 : index
    %c0_20 = arith.constant 0 : index
    %55 = vector.load %arg12[%c0_19, %c0_20] : memref<16x5xf32, #tpu.memory_space<vmem>>, vector<16x5xf32>
    %56 = arith.addf %55, %52 : vector<16x5xf32>
    %c0_21 = arith.constant 0 : index
    %c0_22 = arith.constant 0 : index
    %57 = vector.load %arg12[%c0_21, %c0_22] : memref<16x5xf32, #tpu.memory_space<vmem>>, vector<16x5xf32>
    tpu.vector_store %arg12[%c0_21, %c0_22], %56 {strides = array<i32>} : memref<16x5xf32, #tpu.memory_space<vmem>>, vector<16x5xf32>,
    %58 = arith.extui %21 : i1 to i32
    %c0_i32_23 = arith.constant 0 : i32
    %59 = arith.cmpi ne, %58, %c0_i32_23 : i32
    scf.if %59 {
      %c0_24 = arith.constant 0 : index
      %c0_25 = arith.constant 0 : index
      %60 = vector.load %arg9[%c0_24, %c0_25] : memref<16x5xf32, #tpu.memory_space<vmem>>, vector<16x5xf32>
      %c0_26 = arith.constant 0 : index
      %c0_27 = arith.constant 0 : index
      %61 = vector.load %arg12[%c0_26, %c0_27] : memref<16x5xf32, #tpu.memory_space<vmem>>, vector<16x5xf32>
      %62 = arith.mulf %60, %61 : vector<16x5xf32>
      %63 = vector.shape_cast %62 : vector<16x5xf32> to vector<1x16x5xf32>
      %cst_28 = arith.constant dense<0.000000e+00> : vector<1xf32>
      %64 = vector.multi_reduction <add>, %63, %cst_28 [1, 2] : vector<1x16x5xf32> to vector<1xf32>
      %65 = vector.shape_cast %64 : vector<1xf32> to vector<1x1x1xf32>
      %66 = vector.extract %65[0, 0, 0] : f32 from vector<1x1x1xf32>
      %cst_29 = arith.constant 0.000000e+00 : f32
      %67 = vector.broadcast %cst_29 : f32 to vector<1x128xf32>
      %68 = vector.broadcast %66 : f32 to vector<1x128xf32>
      %69 = arith.addf %67, %68 : vector<1x128xf32>
      %c0_30 = arith.constant 0 : index
      %c0_31 = arith.constant 0 : index
      %70 = vector.load %arg11[%c0_30, %c0_31] : memref<1x128xf32, #tpu.memory_space<vmem>>, vector<1x128xf32>
      tpu.vector_store %arg11[%c0_30, %c0_31], %69 {strides = array<i32>} : memref<1x128xf32, #tpu.memory_space<vmem>>, vector<1x128xf32>,
    } else {
    }
    return
  }
  func.func @transform_0(%arg0: i32, %arg1: i32, %arg2: memref<1x1xi32, #tpu.memory_space<smem>>, %arg3: memref<1x1xi32, #tpu.memory_space<smem>>) -> i32 {
    %c0_i32 = arith.constant 0 : i32
    %c0_i32_0 = arith.constant 0 : i32
    return %c0_i32 : i32
  }
  func.func @transform_1(%arg0: i32, %arg1: i32, %arg2: memref<1x1xi32, #tpu.memory_space<smem>>, %arg3: memref<1x1xi32, #tpu.memory_space<smem>>) -> (i32, i32) {
    %0 = arith.index_cast %arg0 : i32 to index
    %1 = arith.index_cast %arg1 : i32 to index
    %2 = memref.load %arg2[%0, %1] : memref<1x1xi32, #tpu.memory_space<smem>>
    %c0_i32 = arith.constant 0 : i32
    %c0_i32_0 = arith.constant 0 : i32
    return %2, %c0_i32 : i32, i32
  }
  func.func @transform_2(%arg0: i32, %arg1: i32, %arg2: memref<1x1xi32, #tpu.memory_space<smem>>, %arg3: memref<1x1xi32, #tpu.memory_space<smem>>) -> (i32, i32) {
    %0 = arith.index_cast %arg0 : i32 to index
    %1 = arith.index_cast %arg1 : i32 to index
    %2 = memref.load %arg3[%0, %1] : memref<1x1xi32, #tpu.memory_space<smem>>
    %c0_i32 = arith.constant 0 : i32
    %c0_i32_0 = arith.constant 0 : i32
    return %2, %c0_i32 : i32, i32
  }
  func.func @transform_3(%arg0: i32, %arg1: i32, %arg2: memref<1x1xi32, #tpu.memory_space<smem>>, %arg3: memref<1x1xi32, #tpu.memory_space<smem>>) -> (i32, i32) {
    %0 = arith.index_cast %arg0 : i32 to index
    %1 = arith.index_cast %arg1 : i32 to index
    %2 = memref.load %arg2[%0, %1] : memref<1x1xi32, #tpu.memory_space<smem>>
    %c0_i32 = arith.constant 0 : i32
    %c0_i32_0 = arith.constant 0 : i32
    return %2, %c0_i32 : i32, i32
  }
  func.func @transform_4(%arg0: i32, %arg1: i32, %arg2: memref<1x1xi32, #tpu.memory_space<smem>>, %arg3: memref<1x1xi32, #tpu.memory_space<smem>>) -> (i32, i32) {
    %0 = arith.index_cast %arg0 : i32 to index
    %1 = arith.index_cast %arg1 : i32 to index
    %2 = memref.load %arg3[%0, %1] : memref<1x1xi32, #tpu.memory_space<smem>>
    %c0_i32 = arith.constant 0 : i32
    %c0_i32_0 = arith.constant 0 : i32
    return %c0_i32, %2 : i32, i32
  }
  func.func @transform_5(%arg0: i32, %arg1: i32, %arg2: memref<1x1xi32, #tpu.memory_space<smem>>, %arg3: memref<1x1xi32, #tpu.memory_space<smem>>) -> (i32, i32) {
    %0 = arith.index_cast %arg0 : i32 to index
    %1 = arith.index_cast %arg1 : i32 to index
    %2 = memref.load %arg2[%0, %1] : memref<1x1xi32, #tpu.memory_space<smem>>
    %c0_i32 = arith.constant 0 : i32
    %c0_i32_0 = arith.constant 0 : i32
    return %2, %c0_i32 : i32, i32
  }
  func.func @transform_6(%arg0: i32, %arg1: i32, %arg2: memref<1x1xi32, #tpu.memory_space<smem>>, %arg3: memref<1x1xi32, #tpu.memory_space<smem>>) -> (i32, i32) {
    %0 = arith.index_cast %arg0 : i32 to index
    %1 = arith.index_cast %arg1 : i32 to index
    %2 = memref.load %arg3[%0, %1] : memref<1x1xi32, #tpu.memory_space<smem>>
    %c0_i32 = arith.constant 0 : i32
    %c0_i32_0 = arith.constant 0 : i32
    return %2, %c0_i32 : i32, i32
  }
  func.func @transform_7(%arg0: i32, %arg1: i32, %arg2: memref<1x1xi32, #tpu.memory_space<smem>>, %arg3: memref<1x1xi32, #tpu.memory_space<smem>>) -> (i32, i32) {
    %0 = arith.index_cast %arg0 : i32 to index
    %1 = arith.index_cast %arg1 : i32 to index
    %2 = memref.load %arg2[%0, %1] : memref<1x1xi32, #tpu.memory_space<smem>>
    %c0_i32 = arith.constant 0 : i32
    %c0_i32_0 = arith.constant 0 : i32
    return %2, %c0_i32 : i32, i32
  }
}

</mosaic_0001>

<bundles_post_ra>
// kernel: _lmmd_forward.1
= control target key start
LH: loop header
LB: loop body
LE: loop exit
PB: predicated region body
PF: predicated region fallthrough
CT: control target
= control target key end

     0   :  { %16 = vsyncpa [#allocation7], 0  ;;  %s826_s0 = inlined_call_operand.<no memory space> [shape: s32[1,1], index: 0, kind: input, shape index: {}, may-alias: {0,1}]   ;;  %s827_s1 = inlined_call_operand.<no memory space> [shape: s32[1,1], index: 1, kind: input, shape index: {}, may-alias: {0,1}]   ;;  %s828_s2 = inlined_call_operand.vmem [shape: f32[5], index: 2, kind: input, shape index: {}]   ;;  %s829_s3 = inlined_call_operand.vmem [shape: f32[16,32], index: 3, kind: input, shape index: {}, may-alias: {3,4}]   ;;  %s830_s4 = inlined_call_operand.vmem [shape: f32[16,32], index: 4, kind: input, shape index: {}, may-alias: {3,4}]   ;;  %s831_s5 = inlined_call_operand.vmem [shape: f32[16,1], index: 5, kind: input, shape index: {}]   ;;  %s832_s6 = inlined_call_operand.vmem [shape: f32[1,16], index: 6, kind: input, shape index: {}]   ;;  %s833_s7 = inlined_call_operand.vmem [shape: f32[16,5], index: 7, kind: input, shape index: {}, may-alias: {7,8}]   ;;  %s834_s8 = inlined_call_operand.vmem [shape: f32[16,5], index: 8, kind: input, shape index: {}, may-alias: {7,8}]   ;;  %s835_s9 = inlined_call_operand.vmem [shape: f32[1,128], index: 9, kind: output, shape index: {}]  }
   0x1   :  { %s23_s11 = sshll.u32 %s828_s2, 4  ;;  %s24_s11 = int_to_ptr.vmem [resolvable:$true] %s23_s11 }
   0x2   :  { %s696_s12 = scalar_lea.vmem %s24_s11, 16  ;;  %p701_p1 = scmp.lt.s32.totalorder %s24_s11, %s24_s11 }
   0x3   :  { %p697_p0 = scmp.ne.s32.totalorder %s24_s11, %s696_s12  ;;  %p702_p2 = scmp.lt.s32.totalorder %s696_s12, %s696_s12 }
   0x5   :  { %p703_p3 = por %p702_p2, %p701_p1 }
   0x7   :  { %p704_p4 = pnand %p703_p3, %p697_p0 }
   0x9   :  { %707 = shalt.err (!%p704_p4)
}
   0xa   :  { %s710_s13 = smov [#allocation6]  }
   0xb   :  { %26 = dma.vmem_to_smem %s24_s11, 16, %s710_s13, [#allocation7]  }
   0xc   :  { %708 = dma.done.wait [#allocation7], 16  }
   0xd   :  { %709 = vsyncadd [#allocation7], 4294967280 }
   0xe   :  { %123 = sfence }
   0xf   :  { %s638_s16 = sshll.u32 %s827_s1, 1  ;;  %s636_s2 = sshll.u32 %s826_s0, 1  ;;  %v711_v0 = vmov 0   ;;  %vm313_vm0 = vcmask 261120   ;;  %vm454_vm2 = vcmask 130048   ;;  %vm542_vm3 = vcmask 39936  }
  0x10   :  { %p202_p5 = scmp.lt.s32.totalorder %s638_s16, 1  ;;  %p188_p6 = scmp.lt.s32.totalorder %s636_s2, 1  ;;  %691 = vset.pattern.permute.xlu0 %v711_v0  ;;  %vm677_vm1 = vmpackc.low %vm313_vm0, %vm313_vm0  ;;  %v712_v47 = vmov 0.0  }
  0x11   :  { %p229_p7 = scmp.lt.s32.totalorder %s827_s1, 0  ;;  %s651_s17 = sld [smem:[#allocation6 + $0x4]]  ;;  %544 = vst.msk [vmem:[#allocation2 + $0x8] sm:$0xff] %vm542_vm3, %v712_v47  ;;  %543 = vst.msk [vmem:[#allocation2] sm:$0xff] %vm542_vm3, %v712_v47 }
  0x12   :  { %s837_s16 = smov (!%p202_p5, %s638_s16), 1  ;;  %s839_s2 = smov (!%p188_p6, %s636_s2), 1 }
  0x13   :  { %s639_s19 = sshll.u32 %s837_s16, 3  ;;  %s775_s23 = sshll.u32 %s839_s2, 3 }
  0x14   :  { %s205_s22 = scalar_lea.vmem %s830_s4, %s639_s19  ;;  %s191_s26 = scalar_lea.vmem %s829_s3, %s775_s23 }
  0x15   :  { %v311_v1 = vld [vmem:[%s205_s22] sm:$0xff]  ;;  %v312_v2 = vld [vmem:[%s205_s22 + $0x8] sm:$0xff]  ;;  %s219_s29 = scalar_lea.vmem %s831_s5, %s775_s23  ;;  %s258_s3 = scalar_lea.vmem %s834_s8, %s639_s19 }
  0x16   :  { %v676_v3 = vpack.c.bf16 %v312_v2, %v311_v1  ;;  %v309_v4 = vld [vmem:[%s191_s26] sm:$0xff]  ;;  %v402_v6 = vld [vmem:[%s219_s29 + $0x8] sm:$0xff]  ;;  %s230_s13 = scalar_select %p229_p7, %s827_s1, 0 }
  0x17   :  { %v401_v5 = vld [vmem:[%s219_s29] sm:$0xff]  ;;  %666 = vmatprep.mubr.msk.f32.mxu0 %vm313_vm0, %v309_v4  ;;  %v310_v7 = vld [vmem:[%s191_s26 + $0x8] sm:$0xff]  ;;  %v429_v21 = vstv %s651_s17  ;;  %p307_p8 = scmp.eq.s32.totalorder %s826_s0, %s827_s1  ;;  %s244_s22 = scalar_lea.vmem %s833_s7, %s775_s23 }
  0x18   :  { %406 = vperm.xlu0 %691, %v401_v5   ;;  %678 = vmatprep.subr.msk.bf16.mxu0 %vm677_vm1, %v676_v3  ;;  %v452_v8 = vld [vmem:[%s258_s3] sm:$0xff]  ;;  %v453_v9 = vld [vmem:[%s258_s3 + $0x8] sm:$0xff]  ;;  %s231_s16 = scalar_lea.vmem %s832_s6, %s230_s13  ;;  %p268_p9 = scmp.lt.s32.totalorder %s826_s0, 0 }
  0x19   :  { %681 = vmatpush3.bf16.xpose.msk.msra.mxu0 %vm677_vm1, %v676_v3  ;;  %v682_v10 = vpack.c.bf16 %v453_v9, %v452_v8  ;;  %v650_v12 = vld [vmem:[%s231_s16] ss:$0 sm:$0xff]  ;;  %s308_s19 = scalar_select %p307_p8, 1.0, 2.0  ;;  %v546_v50 = vld [vmem:[#allocation2 + $0x8] sm:$0xff] }
  0x1a   :  { %v545_v53 = vld [vmem:[#allocation2] sm:$0xff]  ;;  %v556_v57 = vld [vmem:[%s244_s22 + $0x8] sm:$0xff]  ;;  %s841_s0 = smov (!%p268_p9, %s826_s0), 0 }
  0x1b   :  { %683 = vmatprep.subr.bf16.mxu1 %v682_v10  ;;  %v536_v48 = vstv %s308_s19  ;;  %v555_v58 = vld [vmem:[%s244_s22] sm:$0xff]  ;;  %s270_s27 = scalar_lea.vmem %s835_s9, %s841_s0 }
  0x1c   :  { %411 = vperm.xlu0 %691, %v402_v6   ;;  %685 = vmatpush3.bf16.msra.mxu1 %v682_v10 }
  0x20   :  { %667 = vmatmul.mubr.msk.f32.vlgmr.msra.gmra.mrb[0].mxu0 %vm313_vm0, %v310_v7 }
  0x97   :  { %v407_v11 = vpop.permute.xlu0 %406 }
  0x98   :  { %v420_v18 = vadd.f32 %v650_v12, %v407_v11 }
  0x9b   :  { %v412_v13 = vpop.permute.xlu0 %411 }
  0x9c   :  { %v421_v15 = vadd.f32 %v650_v12, %v412_v13 }
  0xf3   :  { %v668_v14 = vpop.f32.mrb[0].mxu0 }
  0xf4   :  { %v423_v16 = vmul.f32 2.0, %v668_v14  ;;  %v392_v17 = vpop.f32.mrb[1].mxu0 }
  0xf5   :  { %v422_v19 = vmul.f32 2.0, %v392_v17 }
  0xf6   :  { %v425_v20 = vsub.f32 %v421_v15, %v423_v16 }
  0xf7   :  { %v424_v22 = vsub.f32 %v420_v18, %v422_v19 }
  0xf8   :  { %v427_v23 = vmax.f32 %v425_v20, 0.0 }
  0xf9   :  { %v426_v24 = vmax.f32 %v424_v22, 0.0 }
  0xfa   :  { %v431_v25 = vmul.f32 %v429_v21, %v427_v23 }
  0xfb   :  { %v430_v26 = vmul.f32 %v429_v21, %v426_v24 }
  0xfc   :  { %v434_v27 = vmul.f32 1.442695, %v431_v25 }
  0xfd   :  { %v432_v28 = vmul.f32 1.442695, %v430_v26 }
  0xfe   :  { %692 = vpow2.f32 %v434_v27 }
  0xff   :  { %694 = vpow2.f32 %v432_v28 }
 0x108   :  { %v693_v29 = vpop.eup %692 }
 0x109   :  { %v695_v30 = vpop.eup %694  ;;  %v437_v31 = vmul.f32 %v693_v29, %v693_v29 }
 0x10a   :  { %v436_v32 = vmul.f32 %v695_v30, %v695_v30 }
 0x10b   :  { %v439_v33 = vadd.f32 %v693_v29, %v437_v31  ;;  %v441_v34 = vmul.f32 %v437_v31, %v437_v31 }
 0x10c   :  { %v438_v35 = vadd.f32 %v695_v30, %v436_v32  ;;  %v440_v36 = vmul.f32 %v436_v32, %v436_v32 }
 0x10d   :  { %v443_v37 = vadd.f32 %v441_v34, %v439_v33  ;;  %v445_v38 = vmul.f32 %v441_v34, %v441_v34 }
 0x10e   :  { %v442_v39 = vadd.f32 %v440_v36, %v438_v35  ;;  %v444_v40 = vmul.f32 %v440_v36, %v440_v36 }
 0x10f   :  { %v447_v41 = vadd.f32 %v445_v38, %v443_v37  ;;  %v449_v42 = vmul.f32 %v445_v38, %v445_v38 }
 0x110   :  { %v446_v43 = vadd.f32 %v444_v40, %v442_v39  ;;  %v448_v44 = vmul.f32 %v444_v40, %v444_v40 }
 0x111   :  { %v451_v46 = vadd.f32 %v449_v42, %v447_v41 }
 0x112   :  { %v450_v45 = vadd.f32 %v448_v44, %v446_v43 }
 0x114   :  { %673 = vmatprep.mubr.msk.f32.mxu1 %vm454_vm2, %v450_v45 }
 0x115   :  { %674 = vmatmul.mubr.msk.f32.vlgmr.msra.gmra.mrb[0].mxu1 %vm454_vm2, %v451_v46 }
 0x1e8   :  { %v675_v49 = vpop.f32.mrb[0].mxu1 }
 0x1e9   :  { %v538_v51 = vmul.f32 %v675_v49, %v536_v48  ;;  %v527_v52 = vpop.f32.mrb[1].mxu1 }
 0x1ea   :  { %v537_v54 = vmul.f32 %v536_v48, %v527_v52 }
 0x1eb   :  { %v548_v55 = vadd.f32 %v546_v50, %v538_v51 }
 0x1ec   :  { %v547_v56 = vadd.f32 %v545_v53, %v537_v54 }
 0x1ed   :  { %551 = vst.msk [vmem:[#allocation2 + $0x8] sm:$0xff] %vm542_vm3, %v548_v55 }
 0x1ee   :  { %550 = vst.msk [vmem:[#allocation2] sm:$0xff] %vm542_vm3, %v547_v56 }
 0x1f4   :  { %v558_v59 = vld [vmem:[#allocation2 + $0x8] sm:$0xff] }
 0x1f5   :  { %v557_v60 = vld [vmem:[#allocation2] sm:$0xff]  ;;  %v560_v61 = vmul.f32 %v558_v59, %v556_v57 }
 0x1f6   :  { %v559_v62 = vmul.f32 %v557_v60, %v555_v58 }
 0x1f7   :  { %v562_v63 = vsel %vm542_vm3, %v560_v61, 0.0 }
 0x1f8   :  { %v561_v0 = vsel %vm542_vm3, %v559_v62, 0.0 }
 0x1f9   :  { %v563_v1 = vadd.f32 %v562_v63, %v561_v0 }
 0x1fb   :  { %564 = vadd.xlane.f32.xlu1 %v563_v1 }
 0x288   :  { %v565_v2 = vpop.xlane.xlu1 %564 }
 0x289   :  { %v566_v3 = vrot.slane %v565_v2, 4 }
 0x28b   :  { %v567_v4 = vadd.f32 %v566_v3, %v565_v2 }
 0x28d   :  { %v568_v5 = vrot.slane %v567_v4, 2 }
 0x28f   :  { %v569_v6 = vadd.f32 %v568_v5, %v567_v4 }
 0x291   :  { %v570_v7 = vrot.slane %v569_v6, 1 }
 0x293   :  { %v571_v8 = vadd.f32 %v570_v7, %v569_v6 }
 0x295   :  { %686 = vpush %v571_v8 }
 0x2c6   :  { %s687_s28 = spop %686 }
 0x2c7   :  { %v573_v9 = vstv %s687_s28 }
 0x2c8   :  { %575 = vst [vmem:[%s270_s27] sm:$0x1] %v573_v9 }
 0x2c9   :  { %598 = vsyncpa [#allocation7], 1 }

</bundles_post_ra>
